<compile_context>
chip_gen: v6e
topology: v6e:2x2x1
jax: 0.10.0
libtpu: 0.0.40
codegen_flags: <defaults>
</compile_context>

<pallas_src>
import functools

import jax
import jax.numpy as jnp
from jax.experimental import pallas as pl
from jax.experimental.pallas import tpu as pltpu


def _round_up(n, m):
    return ((n + m - 1) // m) * m


def policy_kernel(x_ref, w1_ref, b1_ref, w2_ref, b2_ref, mu_ref):
    # fc1: (TB, S) @ (S, Hp) with f32 accumulation on the MXU.  The x cast to
    # the weight dtype happens here (VPU has plenty of slack) instead of as a
    # separate HBM pass in the wrapper.
    x = x_ref[...].astype(w1_ref.dtype)
    h = jnp.dot(x, w1_ref[...], preferred_element_type=jnp.float32)
    # Bias add + ReLU in f32 (v5e VPU has no bf16 datapath).
    h = jnp.maximum(h + b1_ref[...], 0.0)
    # fc2_mean: (TB, Hp) @ (Hp, Ap); cast h to the weight dtype so the bf16 MXU
    # path is used when compute_dtype=bf16.
    mu = jnp.dot(h.astype(w2_ref.dtype), w2_ref[...],
                 preferred_element_type=jnp.float32)
    mu_ref[...] = (mu + b2_ref[...]).astype(mu_ref.dtype)


def prepare_policy_params(w1, b1, w2, b2, *, compute_dtype=jnp.float32):
    """One-time pad/cast of the weights to the kernel's layout.

    Hidden and action dims are zero-padded to a full 128-lane width (exact with
    zero padding).  Do this ONCE, not per forward call.
    """
    S, H = w1.shape
    H2, A = w2.shape
    assert H == H2, "fc1 out_features must equal fc2 in_features"
    H_pad = _round_up(max(H, 128), 128)
    A_pad = _round_up(max(A, 128), 128)
    w1p = jnp.zeros((S, H_pad), compute_dtype).at[:, :H].set(
        w1.astype(compute_dtype))
    b1p = jnp.zeros((1, H_pad), jnp.float32).at[:, :H].set(
        b1.reshape(1, H).astype(jnp.float32))
    w2p = jnp.zeros((H_pad, A_pad), compute_dtype).at[:H, :A].set(
        w2.astype(compute_dtype))
    b2p = jnp.zeros((1, A_pad), jnp.float32).at[:, :A].set(
        b2.reshape(1, A).astype(jnp.float32))
    return w1p, b1p, w2p, b2p


def _choose_tile_b(B, tile_b, compute_dtype):
    # Don't over-tile tiny batches (8-sublane floor).
    tb = max(8, min(tile_b, _round_up(B, 8)))
    # v7x has 2 TensorCores: for big batches make the (parallel) grid have at
    # least 2 blocks so both cores get work.  Harmless on v5e/v6e.
    if B >= 256:
        tb = min(tb, _round_up(pl.cdiv(B, 2), 8))
    # bf16 packs 2 rows per sublane: keep non-tiny tiles 16-row aligned.
    if compute_dtype == jnp.bfloat16 and tb >= 16:
        tb = _round_up(tb, 16)
    return tb


@functools.partial(
    jax.jit, static_argnames=("action_space", "tile_b", "compute_dtype"))
def policy_forward(x, w1p, b1p, w2p, b2p, sigma_param, *, action_space,
                   tile_b=1024, compute_dtype=jnp.float32):
    """Returns (mu, sigma) — the parameters of Normal(mu, sigma)."""
    B, S = x.shape
    H_pad = w1p.shape[1]
    A_pad = w2p.shape[1]

    tb = _choose_tile_b(B, tile_b, compute_dtype)
    grid = (pl.cdiv(B, tb),)
    out_dtype = jnp.bfloat16 if compute_dtype == jnp.bfloat16 else jnp.float32

    mu_pad = pl.pallas_call(
        policy_kernel,
        out_shape=jax.ShapeDtypeStruct((B, A_pad), out_dtype),
        grid=grid,
        in_specs=[
            pl.BlockSpec((tb, S), lambda i: (i, 0)),          # x: tiled on batch
            pl.BlockSpec((S, H_pad), lambda i: (0, 0)),       # w1: VMEM-resident
            pl.BlockSpec((1, H_pad), lambda i: (0, 0)),       # b1: resident
            pl.BlockSpec((H_pad, A_pad), lambda i: (0, 0)),   # w2: resident
            pl.BlockSpec((1, A_pad), lambda i: (0, 0)),       # b2: resident
        ],
        out_specs=pl.BlockSpec((tb, A_pad), lambda i: (i, 0)),
        compiler_params=pltpu.CompilerParams(
            dimension_semantics=("parallel",)),
    )(x, w1p, b1p, w2p, b2p)

    # Slice off lane padding; rows beyond B never exist in the output array
    # (partial trailing blocks are masked on store).
    mu = mu_pad[:, :action_space]
    # softplus of a single scalar: one XLA op in the wrapper, not a kernel output.
    sigma = jnp.logaddexp(sigma_param.astype(jnp.float32), 0.0)
    return mu, sigma


def init_policy_params(key, state_space, action_space, hidden=64):
    # torch.nn.init.normal_(weight) -> standard normal; biases zeroed; sigma = 10.0
    k1, k2 = jax.random.split(key)
    # PyTorch stores weight as (out, in); we keep the transposed (in, out) layout.
    w1 = jax.random.normal(k1, (state_space, hidden), dtype=jnp.float32)
    b1 = jnp.zeros((1, hidden), dtype=jnp.float32)
    w2 = jax.random.normal(k2, (hidden, action_space), dtype=jnp.float32)
    b2 = jnp.zeros((1, action_space), dtype=jnp.float32)
    sigma_param = jnp.full((1,), 10.0, dtype=jnp.float32)
    return w1, b1, w2, b2, sigma_param


if __name__ == "__main__":
    key = jax.random.PRNGKey(0)
    k_params, k_x = jax.random.split(key)

    batch = 8
    state_space = 8
    action_space = 2
    hidden = 64

    w1, b1, w2, b2, sigma_param = init_policy_params(
        k_params, state_space, action_space, hidden)
    x = jax.random.normal(k_x, (batch, state_space), dtype=jnp.float32)

    # One-time parameter preparation (pad + cast), f32 path.
    w1p, b1p, w2p, b2p = prepare_policy_params(
        w1, b1, w2, b2, compute_dtype=jnp.float32)

    mu, sigma = policy_forward(x, w1p, b1p, w2p, b2p, sigma_param,
                               action_space=action_space)
    jax.block_until_ready((mu, sigma))

    # Reference check in plain JAX (f32 path only).
    h_ref = jnp.maximum(x @ w1 + b1, 0.0)
    mu_ref = h_ref @ w2 + b2
    sigma_ref = jnp.logaddexp(sigma_param, 0.0)
    assert mu.shape == (batch, action_space)
    assert jnp.allclose(mu, mu_ref, atol=1e-4, rtol=1e-4)
    assert jnp.allclose(sigma, sigma_ref, atol=1e-6)

    # bf16 MXU path (the large-batch perf configuration) — smoke-run it too.
    # x stays f32; the cast happens inside the kernel; mu comes back bf16.
    w1b, b1b, w2b, b2b = prepare_policy_params(
        w1, b1, w2, b2, compute_dtype=jnp.bfloat16)
    mu_bf16, _ = policy_forward(x, w1b, b1b, w2b, b2b, sigma_param,
                                action_space=action_space,
                                compute_dtype=jnp.bfloat16)
    jax.block_until_ready(mu_bf16)
    assert mu_bf16.dtype == jnp.bfloat16

    # TODO(synk): torch.distributions.Normal object itself (sampling / log_prob)
    # has no Pallas equivalent; we return its parameters (mu, sigma).
    print("KERNEL_OK")
</pallas_src>

<mosaic_0001>
module attributes {stable_mosaic.version = 11 : i64} {
  func.func @policy_kernel(%arg0: i32, %arg1: memref<8x8xf32, #tpu.memory_space<vmem>>, %arg2: memref<8x128xf32, #tpu.memory_space<vmem>>, %arg3: memref<1x128xf32, #tpu.memory_space<vmem>>, %arg4: memref<128x128xf32, #tpu.memory_space<vmem>>, %arg5: memref<1x128xf32, #tpu.memory_space<vmem>>, %arg6: memref<8x128xf32, #tpu.memory_space<vmem>>) attributes {dimension_semantics = [#tpu.dimension_semantics<parallel>], iteration_bounds = array<i64: 1>, scalar_prefetch = 0 : i64, scratch_operands = 0 : i64, tpu.core_type = #tpu.core_type<tc>, window_params = [{transform_indices = @transform_0, window_bounds = array<i64: 8, 8>}, {pipeline_mode = #tpu.pipeline_mode<synchronous>, transform_indices = @transform_1, window_bounds = array<i64: 8, 128>}, {pipeline_mode = #tpu.pipeline_mode<synchronous>, transform_indices = @transform_2, window_bounds = array<i64: 1, 128>}, {pipeline_mode = #tpu.pipeline_mode<synchronous>, transform_indices = @transform_3, window_bounds = array<i64: 128, 128>}, {pipeline_mode = #tpu.pipeline_mode<synchronous>, transform_indices = @transform_4, window_bounds = array<i64: 1, 128>}, {transform_indices = @transform_5, window_bounds = array<i64: 8, 128>}]} {
    %c0 = arith.constant 0 : index
    %c0_0 = arith.constant 0 : index
    %0 = vector.load %arg1[%c0, %c0_0] : memref<8x8xf32, #tpu.memory_space<vmem>>, vector<8x8xf32>
    %c0_1 = arith.constant 0 : index
    %c0_2 = arith.constant 0 : index
    %1 = vector.load %arg2[%c0_1, %c0_2] : memref<8x128xf32, #tpu.memory_space<vmem>>, vector<8x128xf32>
    %cst = arith.constant dense<0.000000e+00> : vector<8x128xf32>
    %2 = tpu.matmul %0, %1, %cst {dimension_numbers = #tpu.dot_dimension_numbers<[1], [0], [0], [1], [0, 0, 1, 1], [], []>} : vector<8x8xf32>, vector<8x128xf32>, vector<8x128xf32> -> vector<8x128xf32>
    %c0_3 = arith.constant 0 : index
    %c0_4 = arith.constant 0 : index
    %3 = vector.load %arg3[%c0_3, %c0_4] : memref<1x128xf32, #tpu.memory_space<vmem>>, vector<1x128xf32>
    %4 = vector.broadcast %3 : vector<1x128xf32> to vector<8x128xf32>
    %5 = arith.addf %2, %4 : vector<8x128xf32>
    %cst_5 = arith.constant 0.000000e+00 : f32
    %6 = vector.broadcast %cst_5 : f32 to vector<8x128xf32>
    %7 = arith.maximumf %5, %6 : vector<8x128xf32>
    %c0_6 = arith.constant 0 : index
    %c0_7 = arith.constant 0 : index
    %8 = vector.load %arg4[%c0_6, %c0_7] : memref<128x128xf32, #tpu.memory_space<vmem>>, vector<128x128xf32>
    %cst_8 = arith.constant dense<0.000000e+00> : vector<8x128xf32>
    %9 = tpu.matmul %7, %8, %cst_8 {dimension_numbers = #tpu.dot_dimension_numbers<[1], [0], [0], [1], [0, 0, 1, 1], [], []>} : vector<8x128xf32>, vector<128x128xf32>, vector<8x128xf32> -> vector<8x128xf32>
    %c0_9 = arith.constant 0 : index
    %c0_10 = arith.constant 0 : index
    %10 = vector.load %arg5[%c0_9, %c0_10] : memref<1x128xf32, #tpu.memory_space<vmem>>, vector<1x128xf32>
    %11 = vector.broadcast %10 : vector<1x128xf32> to vector<8x128xf32>
    %12 = arith.addf %9, %11 : vector<8x128xf32>
    %c0_11 = arith.constant 0 : index
    %c0_12 = arith.constant 0 : index
    %13 = vector.load %arg6[%c0_11, %c0_12] : memref<8x128xf32, #tpu.memory_space<vmem>>, vector<8x128xf32>
    tpu.vector_store %arg6[%c0_11, %c0_12], %12 {strides = array<i32>} : memref<8x128xf32, #tpu.memory_space<vmem>>, vector<8x128xf32>,
    return
  }
  func.func @transform_0(%arg0: i32) -> (i32, i32) {
    %c0_i32 = arith.constant 0 : i32
    %c0_i32_0 = arith.constant 0 : i32
    return %arg0, %c0_i32 : i32, i32
  }
  func.func @transform_1(%arg0: i32) -> (i32, i32) {
    %c0_i32 = arith.constant 0 : i32
    %c0_i32_0 = arith.constant 0 : i32
    %c0_i32_1 = arith.constant 0 : i32
    return %c0_i32, %c0_i32_0 : i32, i32
  }
  func.func @transform_2(%arg0: i32) -> (i32, i32) {
    %c0_i32 = arith.constant 0 : i32
    %c0_i32_0 = arith.constant 0 : i32
    %c0_i32_1 = arith.constant 0 : i32
    return %c0_i32, %c0_i32_0 : i32, i32
  }
  func.func @transform_3(%arg0: i32) -> (i32, i32) {
    %c0_i32 = arith.constant 0 : i32
    %c0_i32_0 = arith.constant 0 : i32
    %c0_i32_1 = arith.constant 0 : i32
    return %c0_i32, %c0_i32_0 : i32, i32
  }
  func.func @transform_4(%arg0: i32) -> (i32, i32) {
    %c0_i32 = arith.constant 0 : i32
    %c0_i32_0 = arith.constant 0 : i32
    %c0_i32_1 = arith.constant 0 : i32
    return %c0_i32, %c0_i32_0 : i32, i32
  }
  func.func @transform_5(%arg0: i32) -> (i32, i32) {
    %c0_i32 = arith.constant 0 : i32
    %c0_i32_0 = arith.constant 0 : i32
    return %arg0, %c0_i32 : i32, i32
  }
}

</mosaic_0001>

<bundles_post_ra>
// kernel: policy_forward.1
= control target key start
LH: loop header
LB: loop body
LE: loop exit
PB: predicated region body
PF: predicated region fallthrough
CT: control target
= control target key end

     0   :  { %10 = vsyncpa [#allocation3], 0  ;;  %s429_s0 = inlined_call_operand.vmem [shape: f32[8,8], index: 0, kind: input, shape index: {}]   ;;  %s430_s1 = inlined_call_operand.hbm [shape: f32[8,128], index: 1, kind: input, shape index: {}]   ;;  %s431_s2 = inlined_call_operand.vmem [shape: f32[1,128], index: 2, kind: input, shape index: {}]   ;;  %s432_s3 = inlined_call_operand.hbm [shape: f32[128,128], index: 3, kind: input, shape index: {}]   ;;  %s433_s4 = inlined_call_operand.hbm [shape: f32[1,128], index: 4, kind: input, shape index: {}]   ;;  %s434_s5 = inlined_call_operand.vmem [shape: f32[8,128], index: 5, kind: output, shape index: {}]  }
   0x1   :  { %11 = vsyncpa [#allocation5], 0  ;;  %s374_s18 = smov [#allocation4]  }
   0x2   :  { %s31_s19 = sshll.u32 %s374_s18, 4  ;;  %s32_s19 = int_to_ptr.vmem [resolvable:$true] %s31_s19 }
   0x3   :  { %s318_s20 = scalar_lea.vmem %s32_s19, 2048  ;;  %p323_p1 = scmp.lt.s32.totalorder %s32_s19, %s32_s19 }
   0x4   :  { %p319_p0 = scmp.ne.s32.totalorder %s32_s19, %s318_s20  ;;  %p324_p2 = scmp.lt.s32.totalorder %s318_s20, %s318_s20 }
   0x6   :  { %p325_p3 = por %p324_p2, %p323_p1 }
   0x8   :  { %p326_p4 = pnand %p325_p3, %p319_p0 }
   0xa   :  { %329 = shalt.err (!%p326_p4)
}
   0xb   :  { %s375_s21 = smov 128   ;;  %s376_s22 = smov 8  }
   0xc   :  { %37 = dma.hbm_to_vmem [thread:$0]  %s432_s3, 2048, %s32_s19, [#allocation5], %s375_s21, %s375_s21, %s376_s22  }
   0xd   :  { %s377_s25 = smov [#allocation2]   ;;  %s378_s27 = smov [#allocation6]  }
   0xe   :  { %s20_s26 = sshll.u32 %s377_s25, 4  ;;  %s44_s28 = sshll.u32 %s378_s27, 4  ;;  %s21_s26 = int_to_ptr.vmem [resolvable:$true] %s20_s26  ;;  %s45_s28 = int_to_ptr.vmem [resolvable:$true] %s44_s28 }
   0xf   :  { %s338_s29 = scalar_lea.vmem %s21_s26, 128  ;;  %p343_p6 = scmp.lt.s32.totalorder %s21_s26, %s21_s26 }
  0x10   :  { %p339_p5 = scmp.ne.s32.totalorder %s21_s26, %s338_s29  ;;  %p344_p7 = scmp.lt.s32.totalorder %s338_s29, %s338_s29 }
  0x12   :  { %p345_p8 = por %p344_p7, %p343_p6 }
  0x14   :  { %p346_p9 = pnand %p345_p8, %p339_p5 }
  0x16   :  { %349 = shalt.err (!%p346_p9)
}
  0x17   :  { %23 = dma.hbm_to_vmem [thread:$0]  %s430_s1, 128, %s21_s26, [#allocation3]  }
  0x18   :  { %s358_s7 = scalar_lea.vmem %s45_s28, 16  ;;  %s362_s3 = scalar_lea.vmem %s45_s28, 32 }
  0x19   :  { %p359_p10 = scmp.ne.s32.totalorder %s45_s28, %s358_s7  ;;  %p363_p11 = scmp.lt.s32.totalorder %s45_s28, %s45_s28 }
  0x1a   :  { %p364_p12 = scmp.lt.s32.totalorder %s362_s3, %s358_s7 }
  0x1c   :  { %p365_p13 = por %p364_p12, %p363_p11 }
  0x1e   :  { %p366_p0 = pnand %p365_p13, %p359_p10 }
  0x20   :  { %369 = shalt.err (!%p366_p0)
}
  0x21   :  { %47 = dma.hbm_to_vmem [thread:$0]  %s433_s4, 16, %s45_s28, [#allocation5]  }
  0x22   :  { %370 = dma.done.wait [#allocation3], 128  }
  0x23   :  { %371 = vsyncadd [#allocation3], 4294967168 }
  0x24   :  { %372 = dma.done.wait [#allocation5], 2064  }
  0x25   :  { %373 = vsyncadd [#allocation5], 4294965232  ;;  %v379_v0 = vmov 0.0   ;;  %vm380_vm0 = vmmov 0   ;;  %vm66_vm1 = vcmask 64512   ;;  %v58_v1 = vld [vmem:[#allocation2] sm:$0xff] }
  0x26   :  { %263 = vmatprep.subr.mxu0 %v379_v0  ;;  %265 = vmatprep.mubr.msk.f32.mxu0 %vm380_vm0, %v379_v0  ;;  %v57_v2 = vld [vmem:[%s429_s0] sm:$0xff]  ;;  %v155_v4 = vld [vmem:[#allocation4 + $0x70] sm:$0xff]  ;;  %v154_v5 = vld [vmem:[#allocation4 + $0x68] sm:$0xff] }
  0x27   :  { %268 = vmatprep.subr.mxu1 %v379_v0  ;;  %300 = vmatprep.mubr.msk.f32.mxu1 %vm380_vm0, %v379_v0  ;;  %v156_v3 = vld [vmem:[#allocation4 + $0x78] sm:$0xff]  ;;  %v153_v6 = vld [vmem:[#allocation4 + $0x60] sm:$0xff]  ;;  %v151_v8 = vld [vmem:[#allocation4 + $0x50] sm:$0xff] }
  0x28   :  { %264 = vmatpush3.msra.mxu0 %v58_v1  ;;  %269 = vmatpush3.msra.mxu1 %v156_v3  ;;  %v152_v7 = vld [vmem:[#allocation4 + $0x58] sm:$0xff]  ;;  %v150_v9 = vld [vmem:[#allocation4 + $0x48] sm:$0xff]  ;;  %v149_v10 = vld [vmem:[#allocation4 + $0x40] sm:$0xff] }
  0x29   :  { %266 = vmatmul.mubr.msk.f32.vlgmr.msra.gmra.mxu0 %vm66_vm1, %v57_v2  ;;  %270 = vmatprep.subr.mxu1 %v379_v0  ;;  %v148_v11 = vld [vmem:[#allocation4 + $0x38] sm:$0xff]  ;;  %v147_v12 = vld [vmem:[#allocation4 + $0x30] sm:$0xff]  ;;  %v146_v13 = vld [vmem:[#allocation4 + $0x28] sm:$0xff] }
  0x2a   :  { %271 = vmatpush3.msra.mxu1 %v155_v4  ;;  %v145_v14 = vld [vmem:[#allocation4 + $0x20] sm:$0xff]  ;;  %v144_v15 = vld [vmem:[#allocation4 + $0x18] sm:$0xff]  ;;  %v143_v16 = vld [vmem:[#allocation4 + $0x10] sm:$0xff] }
  0x2b   :  { %272 = vmatprep.subr.mxu1 %v379_v0  ;;  %v142_v17 = vld [vmem:[#allocation4 + $0x8] sm:$0xff]  ;;  %v141_v18 = vld [vmem:[#allocation4] sm:$0xff]  ;;  %v241_v19 = vld [vmem:[%s431_s2] ss:$0 sm:$0xff] }
  0x2c   :  { %273 = vmatpush3.msra.mxu1 %v154_v5  ;;  %v243_v24 = vld [vmem:[#allocation6] ss:$0 sm:$0xff] }
  0x2d   :  { %274 = vmatprep.subr.mxu1 %v379_v0 }
  0x2e   :  { %275 = vmatpush3.msra.mxu1 %v153_v6 }
  0x2f   :  { %276 = vmatprep.subr.mxu1 %v379_v0 }
  0x30   :  { %277 = vmatpush3.msra.mxu1 %v152_v7 }
  0x31   :  { %278 = vmatprep.subr.mxu1 %v379_v0 }
  0x32   :  { %279 = vmatpush3.msra.mxu1 %v151_v8 }
  0x33   :  { %280 = vmatprep.subr.mxu1 %v379_v0 }
  0x34   :  { %281 = vmatpush3.msra.mxu1 %v150_v9 }
  0x35   :  { %282 = vmatprep.subr.mxu1 %v379_v0 }
  0x36   :  { %283 = vmatpush3.msra.mxu1 %v149_v10 }
  0x37   :  { %284 = vmatprep.subr.mxu1 %v379_v0 }
  0x38   :  { %285 = vmatpush3.msra.mxu1 %v148_v11 }
  0x39   :  { %286 = vmatprep.subr.mxu1 %v379_v0 }
  0x3a   :  { %287 = vmatpush3.msra.mxu1 %v147_v12 }
  0x3b   :  { %288 = vmatprep.subr.mxu1 %v379_v0 }
  0x3c   :  { %289 = vmatpush3.msra.mxu1 %v146_v13 }
  0x3d   :  { %290 = vmatprep.subr.mxu1 %v379_v0 }
  0x3e   :  { %291 = vmatpush3.msra.mxu1 %v145_v14 }
  0x3f   :  { %292 = vmatprep.subr.mxu1 %v379_v0 }
  0x40   :  { %293 = vmatpush3.msra.mxu1 %v144_v15 }
  0x41   :  { %294 = vmatprep.subr.mxu1 %v379_v0 }
  0x42   :  { %295 = vmatpush3.msra.mxu1 %v143_v16 }
  0x43   :  { %296 = vmatprep.subr.mxu1 %v379_v0 }
  0x44   :  { %297 = vmatpush3.msra.mxu1 %v142_v17 }
  0x45   :  { %298 = vmatprep.subr.mxu1 %v379_v0 }
  0x46   :  { %299 = vmatpush3.msra.mxu1 %v141_v18 }
  0xe9   :  { %v136_v20 = vpop.f32.mrf.mxu0 }
  0xea   :  { %v137_v21 = vadd.f32 %v241_v19, %v136_v20 }
  0xeb   :  { %v267_v22 = vpop.f32.mrf.mxu0 }
  0xec   :  { %v140_v23 = vmax.f32 %v137_v21, 0.0 }
  0xee   :  { %301 = vmatmul.mubr.f32.vlgmr.msra.gmra.mxu1 %v140_v23 }
 0x1ae   :  { %v230_v25 = vpop.f32.mrf.mxu1 }
 0x1af   :  { %v231_v26 = vadd.f32 %v243_v24, %v230_v25 }
 0x1b0   :  { %v302_v27 = vpop.f32.mrf.mxu1 }
 0x1b1   :  { %234 = vst [vmem:[%s434_s5] sm:$0xff] %v231_v26 }
 0x1b2   :  { %239 = vsyncpa [#allocation3], 1 }
 0x1b3   :  { %240 = vsyncpa [#allocation5], 1 }

</bundles_post_ra>
